<compile_context>
chip_gen: v6e
topology: v6e:2x2x1
jax: 0.10.0
libtpu: 0.0.40
codegen_flags: <defaults>
</compile_context>

<pallas_src>
import jax
import jax.numpy as jnp
from jax.experimental import pallas as pl
from jax.experimental.pallas import tpu as pltpu


def _linear_kernel(w_ref, b_ref, xt_ref, o_ref):
    """w_ref: SMEM (F,) f32, b_ref: SMEM (1,) f32,
       xt_ref: VMEM (F, tile_cols) x-dtype, o_ref: VMEM (1, tile_cols) x-dtype."""
    f = xt_ref.shape[0]                                   # static (= 3)
    acc = xt_ref[0:1, :].astype(jnp.float32) * w_ref[0]   # (1, tile) lane-dense VPU mul
    for j in range(1, f):                                 # unrolled FMA chain
        acc = acc + xt_ref[j:j + 1, :].astype(jnp.float32) * w_ref[j]
    o_ref[...] = (acc + b_ref[0]).astype(o_ref.dtype)     # unmasked lane-dense store


def _linear_forward_pallas(x, weight, bias, *, max_tile_cols=65536,
                           target_steps=8, min_tile_cols=8192):
    n, f = x.shape
    out_features = weight.shape[0]

    # Feature-major, lane-dense input.  (Zero-copy if the caller already stores
    # x as (F, N); otherwise one XLA transpose.)
    xt = x.T                                             # (F, N)
    w_flat = weight.reshape(-1).astype(jnp.float32)      # (F,)  -> SMEM scalars
    b_flat = bias.reshape(-1).astype(jnp.float32)        # (1,)  -> SMEM scalar

    # Tile choice: big enough to amortize per-step overhead, multiple of 128,
    # capped for VMEM, and >= target_steps grid steps so v7x megacore helps.
    if n <= min_tile_cols:
        tile = n                                         # single full-extent block
    else:
        tile = pl.cdiv(n, target_steps)
        tile = ((tile + 127) // 128) * 128               # lane-aligned
        tile = max(min_tile_cols, min(tile, max_tile_cols))
    grid = (pl.cdiv(n, tile),)

    itemsize = jnp.dtype(x.dtype).itemsize
    cost = pl.CostEstimate(
        flops=2 * f * n,
        transcendentals=0,
        bytes_accessed=n * f * itemsize + n * itemsize + (f + 1) * 4,
    )

    out = pl.pallas_call(
        _linear_kernel,
        out_shape=jax.ShapeDtypeStruct((out_features, n), x.dtype),
        grid=grid,
        in_specs=[
            pl.BlockSpec(memory_space=pltpu.MemorySpace.SMEM),     # weight (F,)
            pl.BlockSpec(memory_space=pltpu.MemorySpace.SMEM),     # bias   (1,)
            pl.BlockSpec((f, tile), lambda i: (0, i)),             # x.T column tile
        ],
        out_specs=pl.BlockSpec((out_features, tile), lambda i: (0, i)),
        compiler_params=pltpu.CompilerParams(
            dimension_semantics=("parallel",),   # shard batch across v7x's 2 TCs
        ),
        cost_estimate=cost,
    )(w_flat, b_flat, xt)

    return out.reshape(n, out_features)                  # back to (N, 1)


def linear_forward(x, weight, bias, *, min_pallas_rows=65536, max_tile_cols=65536):
    """Equivalent of nn.Linear(3, 1): y = x @ weight.T + bias.

    x:      (N, 3) float  (f32 or bf16; math is f32)
    weight: (1, 3) float32   (PyTorch layout: (out_features, in_features))
    bias:   (1,)   float32
    returns (N, 1) in x.dtype
    """
    n, f = x.shape
    out_features, in_features = weight.shape
    assert in_features == f and out_features == 1

    # At small batch, XLA fusion of x @ W.T + b beats a standalone Pallas call.
    if n < min_pallas_rows:
        return (x.astype(jnp.float32) @ weight.T.astype(jnp.float32)
                + bias.astype(jnp.float32)).astype(x.dtype)

    return _linear_forward_pallas(x, weight, bias, max_tile_cols=max_tile_cols)


if __name__ == "__main__":
    key = jax.random.PRNGKey(0)
    kx, kw, kb, kx2 = jax.random.split(key, 4)

    # Deterministic parameter init (mimicking nn.Linear's uniform init range).
    bound = 1.0 / jnp.sqrt(3.0)
    weight = jax.random.uniform(kw, (1, 3), minval=-bound, maxval=bound,
                                dtype=jnp.float32)
    bias = jax.random.uniform(kb, (1,), minval=-bound, maxval=bound,
                              dtype=jnp.float32)

    # Small shape consistent with Linear(3, 1): batch=8 samples of 3 features.
    x_small = jax.random.normal(kx, (8, 3), dtype=jnp.float32)
    y_small = jax.block_until_ready(
        linear_forward(x_small, weight, bias, min_pallas_rows=0))  # force Pallas path
    y_small_ref = x_small @ weight.T + bias
    assert y_small.shape == (8, 1)
    assert jnp.allclose(y_small, y_small_ref, atol=1e-5), "small-batch mismatch"

    # Medium shape: multi-step grid + ragged (non-multiple-of-128) tail.
    n_med = 8 * 8192 + 37
    x_med = jax.random.normal(kx2, (n_med, 3), dtype=jnp.float32)
    y_med = jax.block_until_ready(
        linear_forward(x_med, weight, bias, min_pallas_rows=0))
    y_med_ref = x_med @ weight.T + bias
    assert y_med.shape == (n_med, 1)
    assert jnp.allclose(y_med, y_med_ref, atol=1e-5), "tiled-grid mismatch"

    # Default path at tiny batch takes the XLA fallback.
    y_fb = jax.block_until_ready(linear_forward(x_small, weight, bias))
    assert jnp.allclose(y_fb, y_small_ref, atol=1e-5), "fallback mismatch"

    print("KERNEL_OK")
</pallas_src>

<mosaic_0001>
module attributes {stable_mosaic.version = 11 : i64} {
  func.func @_linear_kernel(%arg0: i32, %arg1: memref<3xf32, #tpu.memory_space<smem>>, %arg2: memref<1xf32, #tpu.memory_space<smem>>, %arg3: memref<3x8xf32, #tpu.memory_space<vmem>>, %arg4: memref<1x8xf32, #tpu.memory_space<vmem>>) attributes {dimension_semantics = [#tpu.dimension_semantics<parallel>], iteration_bounds = array<i64: 1>, scalar_prefetch = 0 : i64, scratch_operands = 0 : i64, tpu.core_type = #tpu.core_type<tc>, window_params = [{transform_indices = @transform_0, window_bounds = array<i64: 3>}, {transform_indices = @transform_1, window_bounds = array<i64: 1>}, {transform_indices = @transform_2, window_bounds = array<i64: 3, 8>}, {transform_indices = @transform_3, window_bounds = array<i64: 1, 8>}]} {
    %c0 = arith.constant 0 : index
    %c0_0 = arith.constant 0 : index
    %0 = vector.load %arg3[%c0, %c0_0] : memref<3x8xf32, #tpu.memory_space<vmem>>, vector<1x8xf32>
    %c0_1 = arith.constant 0 : index
    %1 = memref.load %arg1[%c0_1] : memref<3xf32, #tpu.memory_space<smem>>
    %2 = vector.broadcast %1 : f32 to vector<1x8xf32>
    %3 = arith.mulf %0, %2 : vector<1x8xf32>
    %c1 = arith.constant 1 : index
    %c0_2 = arith.constant 0 : index
    %4 = vector.load %arg3[%c1, %c0_2] : memref<3x8xf32, #tpu.memory_space<vmem>>, vector<1x8xf32>
    %c1_3 = arith.constant 1 : index
    %5 = memref.load %arg1[%c1_3] : memref<3xf32, #tpu.memory_space<smem>>
    %6 = vector.broadcast %5 : f32 to vector<1x8xf32>
    %7 = arith.mulf %4, %6 : vector<1x8xf32>
    %8 = arith.addf %3, %7 : vector<1x8xf32>
    %c2 = arith.constant 2 : index
    %c0_4 = arith.constant 0 : index
    %9 = vector.load %arg3[%c2, %c0_4] : memref<3x8xf32, #tpu.memory_space<vmem>>, vector<1x8xf32>
    %c2_5 = arith.constant 2 : index
    %10 = memref.load %arg1[%c2_5] : memref<3xf32, #tpu.memory_space<smem>>
    %11 = vector.broadcast %10 : f32 to vector<1x8xf32>
    %12 = arith.mulf %9, %11 : vector<1x8xf32>
    %13 = arith.addf %8, %12 : vector<1x8xf32>
    %c0_6 = arith.constant 0 : index
    %14 = memref.load %arg2[%c0_6] : memref<1xf32, #tpu.memory_space<smem>>
    %15 = vector.broadcast %14 : f32 to vector<1x8xf32>
    %16 = arith.addf %13, %15 : vector<1x8xf32>
    %c0_7 = arith.constant 0 : index
    %c0_8 = arith.constant 0 : index
    %17 = vector.load %arg4[%c0_7, %c0_8] : memref<1x8xf32, #tpu.memory_space<vmem>>, vector<1x8xf32>
    tpu.vector_store %arg4[%c0_7, %c0_8], %16 {strides = array<i32>} : memref<1x8xf32, #tpu.memory_space<vmem>>, vector<1x8xf32>,
    return
  }
  func.func @transform_0(%arg0: i32) -> i32 {
    %c0_i32 = arith.constant 0 : i32
    %c0_i32_0 = arith.constant 0 : i32
    return %c0_i32 : i32
  }
  func.func @transform_1(%arg0: i32) -> i32 {
    %c0_i32 = arith.constant 0 : i32
    %c0_i32_0 = arith.constant 0 : i32
    return %c0_i32 : i32
  }
  func.func @transform_2(%arg0: i32) -> (i32, i32) {
    %c0_i32 = arith.constant 0 : i32
    %c0_i32_0 = arith.constant 0 : i32
    return %c0_i32, %arg0 : i32, i32
  }
  func.func @transform_3(%arg0: i32) -> (i32, i32) {
    %c0_i32 = arith.constant 0 : i32
    %c0_i32_0 = arith.constant 0 : i32
    return %c0_i32, %arg0 : i32, i32
  }
}

</mosaic_0001>

<bundles_post_ra>
// kernel: tpu_custom_call.1
= control target key start
LH: loop header
LB: loop body
LE: loop exit
PB: predicated region body
PF: predicated region fallthrough
CT: control target
= control target key end

     0   :  { %9 = vsyncpa [#allocation6], 0  ;;  %s174_s0 = inlined_call_operand.vmem [shape: f32[3], index: 0, kind: input, shape index: {}]   ;;  %s175_s1 = inlined_call_operand.<no memory space> [shape: f32[1], index: 1, kind: input, shape index: {}]   ;;  %s176_s2 = inlined_call_operand.hbm [shape: f32[3,8], index: 2, kind: input, shape index: {}]   ;;  %s177_s3 = inlined_call_operand.hbm [shape: f32[1,8], index: 3, kind: output, shape index: {}]  }
   0x1   :  { %10 = vsyncpa [#allocation4], 0 }
   0x2   :  { %11 = vsyncpa [#allocation5], 0  ;;  %s18_s14 = sshll.u32 %s174_s0, 4  ;;  %s19_s14 = int_to_ptr.vmem [resolvable:$true] %s18_s14 }
   0x3   :  { %s81_s15 = scalar_lea.vmem %s19_s14, 16  ;;  %p86_p1 = scmp.lt.s32.totalorder %s19_s14, %s19_s14 }
   0x4   :  { %p82_p0 = scmp.ne.s32.totalorder %s19_s14, %s81_s15  ;;  %p87_p2 = scmp.lt.s32.totalorder %s81_s15, %s81_s15 }
   0x6   :  { %p88_p3 = por %p87_p2, %p86_p1 }
   0x8   :  { %p89_p4 = pnand %p88_p3, %p82_p0 }
   0xa   :  { %92 = shalt.err (!%p89_p4)
}
   0xb   :  { %s139_s16 = smov [#allocation3]   ;;  %s140_s17 = smov [#allocation7]  }
   0xc   :  { %21 = dma.vmem_to_smem %s19_s14, 16, %s139_s16, [#allocation6]  }
   0xd   :  { %s30_s18 = sshll.u32 %s140_s17, 4  ;;  %s31_s18 = int_to_ptr.vmem [resolvable:$true] %s30_s18 }
   0xe   :  { %s101_s19 = scalar_lea.vmem %s31_s18, 64  ;;  %p106_p6 = scmp.lt.s32.totalorder %s31_s18, %s31_s18 }
   0xf   :  { %p102_p5 = scmp.ne.s32.totalorder %s31_s18, %s101_s19  ;;  %p107_p7 = scmp.lt.s32.totalorder %s101_s19, %s101_s19 }
  0x11   :  { %p108_p8 = por %p107_p7, %p106_p6 }
  0x13   :  { %p109_p9 = pnand %p108_p8, %p102_p5 }
  0x15   :  { %112 = shalt.err (!%p109_p9)
}
  0x16   :  { %33 = dma.hbm_to_vmem [thread:$0]  %s176_s2, 64, %s31_s18, [#allocation4]  }
  0x17   :  { %133 = dma.done.wait [#allocation6], 16  }
  0x18   :  { %134 = vsyncadd [#allocation6], 4294967280 }
  0x19   :  { %135 = dma.done.wait [#allocation4], 64  }
  0x1a   :  { %136 = vsyncadd [#allocation4], 4294967232 }
  0x1b   :  { %40 = sfence }
  0x1c   :  { %s42_s21 = sld [smem:[#allocation3]]  ;;  %v41_v0 = vld [vmem:[#allocation7] sm:$0x1]  ;;  %v45_v1 = vld [vmem:[#allocation7 + $0x1] sm:$0x1]  ;;  %v56_v10 = vstv %s175_s1  ;;  %s141_s25 = smov [#allocation8]  }
  0x1d   :  { %s76_s22 = sld [smem:[#allocation3 + $0x1]]  ;;  %v50_v3 = vld [vmem:[#allocation7 + $0x2] sm:$0x1]  ;;  %s66_s26 = sshll.u32 %s141_s25, 4  ;;  %vm58_vm0 = vcmask 57344   ;;  %s67_s26 = int_to_ptr.vmem [resolvable:$true] %s66_s26 }
  0x1e   :  { %s77_s23 = sld [smem:[#allocation3 + $0x2]]  ;;  %s113_s27 = scalar_lea.vmem %s67_s26, 16 }
  0x1f   :  { %p114_p10 = scmp.ne.s32.totalorder %s67_s26, %s113_s27  ;;  %s117_s28 = scalar_lea.vmem %s67_s26, 32 }
  0x20   :  { %p118_p11 = scmp.lt.s32.totalorder %s67_s26, %s67_s26  ;;  %p119_p12 = scmp.lt.s32.totalorder %s117_s28, %s113_s27 }
  0x22   :  { %v43_v2 = vstv %s42_s21  ;;  %p120_p13 = por %p119_p12, %p118_p11 }
  0x23   :  { %v44_v4 = vmul.f32 %v43_v2, %v41_v0  ;;  %v47_v5 = vstv %s76_s22 }
  0x24   :  { %v48_v6 = vmul.f32 %v47_v5, %v45_v1  ;;  %v52_v7 = vstv %s77_s23  ;;  %p121_p0 = pnand %p120_p13, %p114_p10 }
  0x25   :  { %v53_v8 = vmul.f32 %v52_v7, %v50_v3 }
  0x26   :  { %v49_v9 = vadd.f32 %v48_v6, %v44_v4 }
  0x28   :  { %v54_v11 = vadd.f32 %v53_v8, %v49_v9 }
  0x2a   :  { %v57_v12 = vadd.f32 %v56_v10, %v54_v11 }
  0x2c   :  { %59 = vst.msk [vmem:[#allocation8] sm:$0x1] %vm58_vm0, %v57_v12 }
  0x2d   :  { %124 = shalt.err (!%p121_p0)
}
  0x2e   :  { %69 = dma.vmem_to_hbm [thread:$0]  %s67_s26, 16, %s177_s3, [#allocation5]  }
  0x2f   :  { %137 = dma.done.wait [#allocation5], 16  }
  0x30   :  { %138 = vsyncadd [#allocation5], 4294967280 }
  0x31   :  { %73 = vsyncpa [#allocation4], 1 }
  0x32   :  { %74 = vsyncpa [#allocation5], 1 }
  0x33   :  { %75 = vsyncpa [#allocation6], 1 }

</bundles_post_ra>
